<compile_context>
chip_gen: v7x
topology: tpu7x:2x2x1
jax: 0.10.0
libtpu: 0.0.40
codegen_flags: <defaults>
</compile_context>

<pallas_src>
import functools

import jax
import jax.numpy as jnp
from jax.experimental import pallas as pl
from jax.experimental.pallas import tpu as pltpu

FEAT = 128  # lane-aligned output / hidden feature width


def _round8(n):
    return max(8, ((n + 7) // 8) * 8)


# ----------------------------------------------------------------------------
# Kernel
# ----------------------------------------------------------------------------
def _mlp_kernel(obs_ref, slab_ref, out_ref, *, layer_offs, layer_rows, bias_off,
                rounding):
    """Fused MLP forward: relu after every layer, optional floor at the end.

    obs_ref : (B, layer_rows[0]) observation, lanes zero-padded to a multiple
              of 8.
    slab_ref: (R, 128) packed weights+biases.
        rows [layer_offs[i], layer_offs[i] + layer_rows[i]) : layer-i weights
              (in_i x out_i, zero-padded; layer-last output cols padded to 128)
        rows [bias_off, bias_off + 8)                       : biases, row i =
              layer-i bias (cols zero-padded to 128)
    out_ref : (B, 128) lane-dense output; only columns 0:2 are meaningful.
    """
    f32 = jnp.float32
    bias = slab_ref[bias_off:bias_off + 8, :]          # one (8,128) tile
    h = obs_ref[...]
    for i, (off, rows) in enumerate(zip(layer_offs, layer_rows)):
        x = h if h.shape[1] == rows else h[:, :rows]   # static lane-prefix slice
        h = jnp.dot(x, slab_ref[off:off + rows, :], preferred_element_type=f32)
        # torch module applies relu after every layer (incl. the output layer).
        # TODO(synk): custom `activations` hooks are not supported; relu only.
        h = jnp.maximum(h + bias[i:i + 1, :], 0.0)
    if rounding:
        # Forward value of torch's `h - frac(h).detach()` is floor(h) for h>=0.
        # TODO(synk): straight-through gradient would need a custom_vjp wrapper.
        h = jnp.floor(h)
    out_ref[...] = h


# ----------------------------------------------------------------------------
# Parameter packing (once, off the hot path)
# ----------------------------------------------------------------------------
def pack_params(params, *, lr, le):
    """Pack (w0, b0, w1, b1, ...) into a single 8-row-aligned (R, 128) slab.

    w_i has shape (in_i, out_i); b_i has shape (1, out_i) or (out_i,).
    Returns (slab, meta) where meta holds the static row offsets the kernel
    needs.  Independent of history lengths (the observation is built wrapper
    side), so this is called exactly once per parameter set.
    """
    n_layers = len(params) // 2
    if n_layers < 1 or len(params) != 2 * n_layers:
        raise ValueError("params must be a flat (w0, b0, w1, b1, ...) tuple")
    if n_layers > 8:
        raise ValueError("at most 8 layers supported (single 8-row bias block)")
    ws = [jnp.asarray(params[2 * i], jnp.float32) for i in range(n_layers)]
    bs = [jnp.asarray(params[2 * i + 1], jnp.float32).reshape(-1)
          for i in range(n_layers)]

    d_in = lr + le + 1
    if ws[0].shape[0] != d_in:
        raise ValueError(
            f"layer 0 expects in_features={d_in} (= lr+le+1), got {ws[0].shape[0]}")
    for i, (w, b) in enumerate(zip(ws, bs)):
        if w.shape[0] > FEAT or w.shape[1] > FEAT:
            raise ValueError(f"layer {i} shape {tuple(w.shape)} exceeds {FEAT} lanes")
        if b.shape[0] != w.shape[1]:
            raise ValueError(f"layer {i} bias width {b.shape[0]} != out {w.shape[1]}")
        if i > 0 and w.shape[0] != ws[i - 1].shape[1]:
            raise ValueError(f"layer {i} in_features does not match layer {i-1} out")

    layer_rows = tuple(_round8(w.shape[0]) for w in ws)
    layer_offs, r = [], 0
    for rows in layer_rows:
        layer_offs.append(r)
        r += rows
    bias_off = r
    n_rows = bias_off + 8                      # multiple of 8 by construction

    slab = jnp.zeros((n_rows, FEAT), jnp.float32)
    for i, (w, b) in enumerate(zip(ws, bs)):
        slab = slab.at[layer_offs[i]:layer_offs[i] + w.shape[0], :w.shape[1]].set(w)
        slab = slab.at[bias_off + i, :w.shape[1]].set(b)

    meta = dict(layer_offs=tuple(layer_offs), layer_rows=layer_rows,
                bias_off=bias_off)
    return slab, meta


# ----------------------------------------------------------------------------
# Observation assembly (tiny; fuses in XLA ahead of the kernel)
# ----------------------------------------------------------------------------
def build_observation(past_inventories, past_regular_orders,
                      past_expedited_orders, *, lr, le, k_pad):
    """Matches the torch observation build; returns (B, k_pad) f32."""
    inv = jnp.asarray(past_inventories, jnp.float32)
    B = inv.shape[0]
    pieces = [inv[:, -1:, 0]]
    if lr > 0:
        reg = jnp.asarray(past_regular_orders, jnp.float32)
        if reg.shape[1] == 0:                      # torch zero-fills empty history
            reg = jnp.zeros((B, lr, 1), jnp.float32)
        elif reg.shape[1] < lr:
            raise ValueError(f"regular-order history ({reg.shape[1]}) shorter than lr={lr}")
        pieces.append(reg[:, -lr:, 0])
    if le > 0:
        exp = jnp.asarray(past_expedited_orders, jnp.float32)
        if exp.shape[1] == 0:
            exp = jnp.zeros((B, le, 1), jnp.float32)
        elif exp.shape[1] < le:
            raise ValueError(f"expedited-order history ({exp.shape[1]}) shorter than le={le}")
        pieces.append(exp[:, -le:, 0])
    obs = jnp.concatenate(pieces, axis=1)          # (B, lr+le+1)
    pad = k_pad - obs.shape[1]
    if pad < 0:
        raise ValueError("observation wider than packed layer-0 block")
    if pad:
        obs = jnp.pad(obs, ((0, 0), (0, pad)))
    return obs


# ----------------------------------------------------------------------------
# Forward wrappers
# ----------------------------------------------------------------------------
def fc_controller_forward(packed, past_demands, past_inventories,
                          past_regular_orders, past_expedited_orders,
                          past_costs, *, lr, le, allow_rounding_correction=True):
    """Matches FCController.forward; returns (qr, qe, None)."""
    del past_demands, past_costs                   # unused by the torch module
    slab, meta = packed
    obs = build_observation(past_inventories, past_regular_orders,
                            past_expedited_orders, lr=lr, le=le,
                            k_pad=meta["layer_rows"][0])
    B = obs.shape[0]
    kernel = functools.partial(_mlp_kernel, rounding=allow_rounding_correction,
                               **meta)
    # Single-shot call: ~40 KiB of weights + a few KiB of activations, all
    # VMEM-resident.  For per-environment-step rollouts use
    # fc_controller_forward_steps (weights stay VMEM-resident across steps).
    # For very large B, add a batch grid with dimension_semantics=("parallel",)
    # (shards across v7x's two TensorCores) and size blocks for 64 MiB VMEM.
    h = pl.pallas_call(
        kernel,
        out_shape=jax.ShapeDtypeStruct((B, FEAT), jnp.float32),
        in_specs=[pl.BlockSpec(memory_space=pltpu.MemorySpace.VMEM)] * 2,
        out_specs=pl.BlockSpec(memory_space=pltpu.MemorySpace.VMEM),
    )(obs, slab)
    return h[:, 0:1], h[:, 1:2], None


def fc_controller_forward_steps(packed, obs_steps, *,
                                allow_rounding_correction=True):
    """Evaluate S controller steps in ONE pallas_call (persistent weights).

    obs_steps: (S, B, k_pad) pre-built observations (see build_observation).
    The weight slab's index_map returns block (0, 0) for every step, so it is
    DMA'd into VMEM once and reused for the whole step grid — amortizing the
    per-call launch + weight-DMA overhead that dominates this kernel.
    """
    slab, meta = packed
    S, B, k_pad = obs_steps.shape
    if k_pad != meta["layer_rows"][0]:
        raise ValueError("obs_steps lane width does not match packed layer 0")
    n_rows = slab.shape[0]
    kernel = functools.partial(_mlp_kernel, rounding=allow_rounding_correction,
                               **meta)
    h = pl.pallas_call(
        kernel,
        out_shape=jax.ShapeDtypeStruct((S, B, FEAT), jnp.float32),
        grid=(S,),
        in_specs=[pl.BlockSpec((None, B, k_pad), lambda s: (s, 0, 0)),
                  pl.BlockSpec((n_rows, FEAT), lambda s: (0, 0))],
        out_specs=pl.BlockSpec((None, B, FEAT), lambda s: (s, 0, 0)),
        compiler_params=pltpu.CompilerParams(
            dimension_semantics=("arbitrary",)),
    )(obs_steps, slab)
    return h[..., 0:1], h[..., 1:2]


# ----------------------------------------------------------------------------
# Init + pure-JAX reference (for verification)
# ----------------------------------------------------------------------------
def init_params(key, d_in, hidden, d_out=2):
    """torch.nn.Linear-style init: U(-1/sqrt(fan_in), 1/sqrt(fan_in))."""
    dims = [d_in] + list(hidden) + [d_out]
    params = []
    for i in range(len(dims) - 1):
        key, kw, kb = jax.random.split(key, 3)
        bound = 1.0 / jnp.sqrt(jnp.float32(dims[i]))
        w = jax.random.uniform(kw, (dims[i], dims[i + 1]), jnp.float32, -bound, bound)
        b = jax.random.uniform(kb, (1, dims[i + 1]), jnp.float32, -bound, bound)
        params += [w, b]
    return tuple(params)


def _reference_prefloor(params, past_inventories, past_regular_orders,
                        past_expedited_orders, *, lr, le):
    """Pure-JAX reference of the torch forward, WITHOUT the final floor."""
    obs_list = [jnp.asarray(past_inventories, jnp.float32)[:, -1:, :]]
    if lr > 0:
        obs_list.append(jnp.asarray(past_regular_orders, jnp.float32)[:, -lr:, :])
    if le > 0:
        obs_list.append(jnp.asarray(past_expedited_orders, jnp.float32)[:, -le:, :])
    h = jnp.concatenate(obs_list, axis=1)[..., 0]
    for i in range(len(params) // 2):
        w, b = params[2 * i], params[2 * i + 1]
        h = jnp.maximum(h @ w + b, 0.0)
    return h[:, 0:1], h[:, 1:2]


def _floor_matches(got, pre_ref, tol=1e-3):
    """Integer-aware comparison of floored outputs (robust near boundaries)."""
    want = jnp.floor(pre_ref)
    near_int = jnp.abs(pre_ref - jnp.round(pre_ref)) < tol
    return bool(jnp.all((jnp.abs(got - want) < 1e-5) | near_int))


# ----------------------------------------------------------------------------
# Demo / self-test
# ----------------------------------------------------------------------------
if __name__ == "__main__":
    LR, LE = 2, 3                          # regular / expedited lead times
    HIDDEN = [32, 32]                      # n_hidden_units
    B, T = 8, 8                            # batch, history length
    D_IN = LR + LE + 1

    key = jax.random.PRNGKey(0)
    kp, kd, ki, kr, ke, kc, ks = jax.random.split(key, 7)

    params = init_params(kp, D_IN, HIDDEN)
    packed = pack_params(params, lr=LR, le=LE)     # once, off the hot path

    past_demands = 5.0 * jax.random.uniform(kd, (B, T, 1), jnp.float32)
    past_inventories = 10.0 * jax.random.uniform(ki, (B, T, 1), jnp.float32)
    past_regular_orders = 5.0 * jax.random.uniform(kr, (B, T, 1), jnp.float32)
    past_expedited_orders = 5.0 * jax.random.uniform(ke, (B, T, 1), jnp.float32)
    past_costs = jax.random.uniform(kc, (B, T, 1), jnp.float32)

    # --- single forward (matches FCController.forward) ----------------------
    qr, qe, extra = fc_controller_forward(
        packed, past_demands, past_inventories, past_regular_orders,
        past_expedited_orders, past_costs, lr=LR, le=LE)
    qr = jax.block_until_ready(qr)
    qe = jax.block_until_ready(qe)
    assert qr.shape == (B, 1) and qe.shape == (B, 1) and extra is None

    pre_r, pre_e = _reference_prefloor(
        params, past_inventories, past_regular_orders, past_expedited_orders,
        lr=LR, le=LE)

    # Tight check of the MLP math (rounding disabled so floor can't flip bits).
    qr_nr, qe_nr, _ = fc_controller_forward(
        packed, past_demands, past_inventories, past_regular_orders,
        past_expedited_orders, past_costs, lr=LR, le=LE,
        allow_rounding_correction=False)
    assert jnp.allclose(qr_nr, pre_r, atol=1e-4, rtol=1e-4)
    assert jnp.allclose(qe_nr, pre_e, atol=1e-4, rtol=1e-4)

    # Integer-aware check of the rounded outputs.
    assert _floor_matches(qr, pre_r)
    assert _floor_matches(qe, pre_e)

    # --- multi-step rollout path: weights DMA'd once, resident across steps --
    S = 4
    inv_steps = 10.0 * jax.random.uniform(ks, (S, B, T, 1), jnp.float32)
    k_pad = packed[1]["layer_rows"][0]
    obs_steps = jnp.stack([
        build_observation(inv_steps[s], past_regular_orders,
                          past_expedited_orders, lr=LR, le=LE, k_pad=k_pad)
        for s in range(S)])
    qr_s, qe_s = fc_controller_forward_steps(packed, obs_steps)
    qr_s = jax.block_until_ready(qr_s)
    qe_s = jax.block_until_ready(qe_s)
    assert qr_s.shape == (S, B, 1) and qe_s.shape == (S, B, 1)
    for s in range(S):
        pr, pe = _reference_prefloor(
            params, inv_steps[s], past_regular_orders, past_expedited_orders,
            lr=LR, le=LE)
        assert _floor_matches(qr_s[s], pr)
        assert _floor_matches(qe_s[s], pe)

    print("KERNEL_OK")
</pallas_src>

<mosaic_0001>
module attributes {stable_mosaic.version = 11 : i64} {
  func.func @_mlp_kernel(%arg0: memref<8x8xf32, #tpu.memory_space<vmem>>, %arg1: memref<80x128xf32, #tpu.memory_space<vmem>>, %arg2: memref<8x128xf32, #tpu.memory_space<vmem>>) attributes {dimension_semantics = [], scalar_prefetch = 0 : i64, scratch_operands = 0 : i64, tpu.core_type = #tpu.core_type<tc>} {
    %c72 = arith.constant 72 : index
    %c0 = arith.constant 0 : index
    %0 = vector.load %arg1[%c72, %c0] : memref<80x128xf32, #tpu.memory_space<vmem>>, vector<8x128xf32>
    %c0_0 = arith.constant 0 : index
    %c0_1 = arith.constant 0 : index
    %1 = vector.load %arg0[%c0_0, %c0_1] : memref<8x8xf32, #tpu.memory_space<vmem>>, vector<8x8xf32>
    %c0_2 = arith.constant 0 : index
    %c0_3 = arith.constant 0 : index
    %2 = vector.load %arg1[%c0_2, %c0_3] : memref<80x128xf32, #tpu.memory_space<vmem>>, vector<8x128xf32>
    %cst = arith.constant dense<0.000000e+00> : vector<8x128xf32>
    %3 = tpu.matmul %1, %2, %cst {dimension_numbers = #tpu.dot_dimension_numbers<[1], [0], [0], [1], [0, 0, 1, 1], [], []>} : vector<8x8xf32>, vector<8x128xf32>, vector<8x128xf32> -> vector<8x128xf32>
    %4 = vector.extract_strided_slice %0 {offsets = [0, 0], sizes = [1, 128], strides = [1, 1]} : vector<8x128xf32> to vector<1x128xf32>
    %5 = vector.broadcast %4 : vector<1x128xf32> to vector<8x128xf32>
    %6 = arith.addf %3, %5 : vector<8x128xf32>
    %cst_4 = arith.constant 0.000000e+00 : f32
    %7 = vector.broadcast %cst_4 : f32 to vector<8x128xf32>
    %8 = arith.maximumf %6, %7 : vector<8x128xf32>
    %9 = vector.extract_strided_slice %8 {offsets = [0, 0], sizes = [8, 32], strides = [1, 1]} : vector<8x128xf32> to vector<8x32xf32>
    %c8 = arith.constant 8 : index
    %c0_5 = arith.constant 0 : index
    %10 = vector.load %arg1[%c8, %c0_5] : memref<80x128xf32, #tpu.memory_space<vmem>>, vector<32x128xf32>
    %cst_6 = arith.constant dense<0.000000e+00> : vector<8x128xf32>
    %11 = tpu.matmul %9, %10, %cst_6 {dimension_numbers = #tpu.dot_dimension_numbers<[1], [0], [0], [1], [0, 0, 1, 1], [], []>} : vector<8x32xf32>, vector<32x128xf32>, vector<8x128xf32> -> vector<8x128xf32>
    %12 = vector.extract_strided_slice %0 {offsets = [1, 0], sizes = [1, 128], strides = [1, 1]} : vector<8x128xf32> to vector<1x128xf32>
    %13 = vector.broadcast %12 : vector<1x128xf32> to vector<8x128xf32>
    %14 = arith.addf %11, %13 : vector<8x128xf32>
    %cst_7 = arith.constant 0.000000e+00 : f32
    %15 = vector.broadcast %cst_7 : f32 to vector<8x128xf32>
    %16 = arith.maximumf %14, %15 : vector<8x128xf32>
    %17 = vector.extract_strided_slice %16 {offsets = [0, 0], sizes = [8, 32], strides = [1, 1]} : vector<8x128xf32> to vector<8x32xf32>
    %c40 = arith.constant 40 : index
    %c0_8 = arith.constant 0 : index
    %18 = vector.load %arg1[%c40, %c0_8] : memref<80x128xf32, #tpu.memory_space<vmem>>, vector<32x128xf32>
    %cst_9 = arith.constant dense<0.000000e+00> : vector<8x128xf32>
    %19 = tpu.matmul %17, %18, %cst_9 {dimension_numbers = #tpu.dot_dimension_numbers<[1], [0], [0], [1], [0, 0, 1, 1], [], []>} : vector<8x32xf32>, vector<32x128xf32>, vector<8x128xf32> -> vector<8x128xf32>
    %20 = vector.extract_strided_slice %0 {offsets = [2, 0], sizes = [1, 128], strides = [1, 1]} : vector<8x128xf32> to vector<1x128xf32>
    %21 = vector.broadcast %20 : vector<1x128xf32> to vector<8x128xf32>
    %22 = arith.addf %19, %21 : vector<8x128xf32>
    %cst_10 = arith.constant 0.000000e+00 : f32
    %23 = vector.broadcast %cst_10 : f32 to vector<8x128xf32>
    %24 = arith.maximumf %22, %23 : vector<8x128xf32>
    %25 = math.floor %24 : vector<8x128xf32>
    %c0_11 = arith.constant 0 : index
    %c0_12 = arith.constant 0 : index
    %26 = vector.load %arg2[%c0_11, %c0_12] : memref<8x128xf32, #tpu.memory_space<vmem>>, vector<8x128xf32>
    tpu.vector_store %arg2[%c0_11, %c0_12], %25 {strides = array<i32>} : memref<8x128xf32, #tpu.memory_space<vmem>>, vector<8x128xf32>,
    return
  }
}

</mosaic_0001>

<bundles_post_ra>
// kernel: tpu_custom_call.1
= control target key start
LH: loop header
LB: loop body
LE: loop exit
PB: predicated region body
PF: predicated region fallthrough
CT: control target
= control target key end

     0   :  { %7 = vsyncpa [#allocation3], 0  ;;  %s503_s0 = inlined_call_operand.hbm [shape: f32[8,8], index: 0, kind: input, shape index: {}]   ;;  %s504_s1 = inlined_call_operand.hbm [shape: f32[80,128], index: 1, kind: input, shape index: {}]   ;;  %s505_s2 = inlined_call_operand.hbm [shape: f32[8,128], index: 2, kind: output, shape index: {}]  }
   0x1   :  { %8 = vsyncpa [#allocation6], 0 }
   0x2   :  { %9 = vsyncpa [#allocation4], 0  ;;  %s437_s9 = smov [#allocation2]   ;;  %s438_s11 = smov [#allocation5]  }
   0x3   :  { %s16_s10 = sshll.u32 %s437_s9, 4  ;;  %s25_s12 = sshll.u32 %s438_s11, 4  ;;  %s17_s10 = int_to_ptr.vmem [resolvable:$true] %s16_s10  ;;  %s460_s12 = int_to_ptr.vmem [resolvable:$true] %s25_s12 }
   0x4   :  { %s365_s15 = scalar_lea.hbm %s503_s0, 128 }
   0x5   :  { %p366_p0 = scmp.ne.s32.totalorder %s503_s0, %s365_s15  ;;  %p369_p1 = scmp.lt.u32.totalorder %s365_s15, %s503_s0 }
   0x7   :  { %p371_p2 = pnand %p369_p1, %p366_p0 }
   0x9   :  { %374 = shalt.err (!%p371_p2)
}
   0xa   :  { %s375_s20 = scalar_lea.vmem %s17_s10, 128  ;;  %p380_p4 = scmp.lt.s32.totalorder %s17_s10, %s17_s10 }
   0xb   :  { %p376_p3 = scmp.ne.s32.totalorder %s17_s10, %s375_s20  ;;  %p381_p5 = scmp.lt.s32.totalorder %s375_s20, %s375_s20 }
   0xd   :  { %p382_p6 = por %p381_p5, %p380_p4 }
   0xf   :  { %p383_p7 = pnand %p382_p6, %p376_p3 }
  0x11   :  { %386 = shalt.err (!%p383_p7)
}
  0x12   :  { %19 = dma.hbm_to_vmem [thread:$0]  %s503_s0, 128, %s17_s10, [#allocation3]  }
  0x13   :  { %s387_s25 = scalar_lea.hbm %s504_s1, 1280 }
  0x14   :  { %p388_p8 = scmp.ne.s32.totalorder %s504_s1, %s387_s25  ;;  %p391_p9 = scmp.lt.u32.totalorder %s387_s25, %s504_s1 }
  0x16   :  { %p393_p10 = pnand %p391_p9, %p388_p8 }
  0x18   :  { %396 = shalt.err (!%p393_p10)
}
  0x19   :  { %s397_s30 = scalar_lea.vmem %s460_s12, 1280  ;;  %p402_p12 = scmp.lt.s32.totalorder %s460_s12, %s460_s12 }
  0x1a   :  { %p398_p11 = scmp.ne.s32.totalorder %s460_s12, %s397_s30  ;;  %p403_p13 = scmp.lt.s32.totalorder %s397_s30, %s397_s30 }
  0x1c   :  { %p404_p0 = por %p403_p13, %p402_p12 }
  0x1e   :  { %p405_p1 = pnand %p404_p0, %p398_p11 }
  0x20   :  { %408 = shalt.err (!%p405_p1)
}
  0x21   :  { %s439_s0 = smov 128   ;;  %s440_s3 = smov 8  }
  0x22   :  { %31 = dma.hbm_to_vmem [thread:$0]  %s504_s1, 1280, %s460_s12, [#allocation6], %s439_s0, %s439_s0, %s440_s3  }
  0x23   :  { %431 = dma.done.wait [#allocation3], 128  }
  0x24   :  { %432 = vsyncadd [#allocation3], 4294967168 }
  0x25   :  { %433 = dma.done.wait [#allocation6], 1280  }
  0x26   :  { %434 = vsyncadd [#allocation6], 4294966016  ;;  %v441_v0 = vmov 0.0   ;;  %vm442_vm0 = vmmov 0   ;;  %v443_v1 = vmov 0.0|0.0   ;;  %vm45_vm1 = vcmask 64512  }
  0x27   :  { %318 = vmatprep.subr.mxu0 %v441_v0  ;;  %320 = vmatprep.mubr.msk.f32.mxu0 %vm442_vm0, %v441_v0  ;;  %v40_v2 = vld [vmem:[#allocation5] sm:$0xff]  ;;  %v39_v3 = vld [vmem:[#allocation2] sm:$0xff]  ;;  %v120_v4 = vld [vmem:[#allocation5 + $0x8] sm:$0xff]  ;;  %v41_v13 = vlaneseq  ;;  %vm128_vm2 = vcmask 261120   ;;  %s444_s1 = smov [#allocation7]  }
  0x28   :  { %345 = vmatprep.subr.bf16.mxu1 %v443_v1  ;;  %331 = vmatprep.mubr.msk.f32.mxu1 %vm442_vm0, %v441_v0  ;;  %v121_v5 = vld [vmem:[#allocation5 + $0x10] sm:$0xff]  ;;  %v122_v7 = vld [vmem:[#allocation5 + $0x18] sm:$0xff]  ;;  %v123_v8 = vld [vmem:[#allocation5 + $0x20] sm:$0xff]  ;;  %s293_s6 = sshll.u32 %s444_s1, 4  ;;  %s294_s6 = int_to_ptr.vmem [resolvable:$true] %s293_s6 }
  0x29   :  { %319 = vmatpush3.msra.mxu0 %v40_v2  ;;  %v346_v6 = vpack.c.bf16 %v121_v5, %v120_v4  ;;  %v349_v9 = vpack.c.bf16 %v123_v8, %v122_v7  ;;  %v203_v10 = vld [vmem:[#allocation5 + $0x28] sm:$0xff]  ;;  %v204_v11 = vld [vmem:[#allocation5 + $0x30] sm:$0xff]  ;;  %v42_v14 = vshrl.u32 %v41_v13, 7  ;;  %v205_v22 = vld [vmem:[#allocation5 + $0x38] sm:$0xff]  ;;  %s409_s7 = scalar_lea.vmem %s294_s6, 128  ;;  %p414_p3 = scmp.lt.s32.totalorder %s294_s6, %s294_s6 }
  0x2a   :  { %321 = vmatmul.mubr.msk.f32.vlgmr.msra.gmra.mrb[0].mxu0 %vm45_vm1, %v39_v3  ;;  %351 = vmatprep.subr.bf16.mxu0 %v443_v1  ;;  %v352_v12 = vpack.c.bf16 %v204_v11, %v203_v10  ;;  %v38_v16 = vld [vmem:[#allocation5 + $0x48] sm:$0xff]  ;;  %v206_v23 = vld [vmem:[#allocation5 + $0x40] sm:$0xff]  ;;  %p410_p2 = scmp.ne.s32.totalorder %s294_s6, %s409_s7  ;;  %p415_p4 = scmp.lt.s32.totalorder %s409_s7, %s409_s7 }
  0x2b   :  { %342 = vmatprep.mubr.msk.f32.mxu0 %vm442_vm0, %v441_v0  ;;  %347 = vmatpush3.bf16.msra.mxu1 %v346_v6  ;;  %v43_v15 = vsub.s32 0, %v42_v14  ;;  %v355_v24 = vpack.c.bf16 %v206_v23, %v205_v22  ;;  %v126_v25 = vsub.s32 1, %v42_v14  ;;  %v209_v31 = vsub.s32 2, %v42_v14 }
  0x2c   :  { %348 = vmatprep.subr.bf16.mxu1 %v443_v1  ;;  %353 = vmatpush3.bf16.msra.mxu0 %v352_v12  ;;  %p416_p5 = por %p415_p4, %p414_p3 }
  0x2d   :  { %354 = vmatprep.subr.bf16.mxu0 %v443_v1  ;;  %v44_v17 = vrot.slane %v38_v16, %v43_v15  ;;  %v127_v26 = vrot.slane %v38_v16, %v126_v25  ;;  %v210_v32 = vrot.slane %v38_v16, %v209_v31 }
  0x2e   :  { %p417_p6 = pnand %p416_p5, %p410_p2 }
  0x2f   :  { %350 = vmatpush3.bf16.msra.mxu1 %v349_v9 }
  0x30   :  { %356 = vmatpush3.bf16.msra.mxu0 %v355_v24 }
  0xfd   :  { %v115_v18 = vpop.f32.mrb[0].mxu0 }
  0xfe   :  { %v116_v19 = vadd.f32 %v115_v18, %v44_v17  ;;  %v322_v20 = vpop.f32.mrb[1].mxu0 }
 0x100   :  { %v119_v21 = vmax.f32 %v116_v19, 0.0 }
 0x102   :  { %332 = vmatmul.mubr.msk.f32.vlgmr.msra.gmra.mrb[0].mxu1 %vm128_vm2, %v119_v21 }
 0x1d5   :  { %v198_v27 = vpop.f32.mrb[0].mxu1 }
 0x1d6   :  { %v199_v28 = vadd.f32 %v198_v27, %v127_v26  ;;  %v333_v29 = vpop.f32.mrb[1].mxu1 }
 0x1d8   :  { %v202_v30 = vmax.f32 %v199_v28, 0.0 }
 0x1da   :  { %343 = vmatmul.mubr.msk.f32.vlgmr.msra.gmra.mrb[2].mxu0 %vm128_vm2, %v202_v30 }
 0x2ad   :  { %v280_v33 = vpop.f32.mrb[2].mxu0 }
 0x2ae   :  { %v281_v34 = vadd.f32 %v280_v33, %v210_v32  ;;  %v344_v35 = vpop.f32.mrb[3].mxu0 }
 0x2b0   :  { %v284_v36 = vmax.f32 %v281_v34, 0.0 }
 0x2b2   :  { %v285_v37 = vfloor.f32 %v284_v36 }
 0x2b4   :  { %286 = vst [vmem:[#allocation7] sm:$0xff] %v285_v37 }
 0x2b5   :  { %420 = shalt.err (!%p417_p6)
}
 0x2b6   :  { %s421_s10 = scalar_lea.hbm %s505_s2, 128 }
 0x2b7   :  { %p422_p7 = scmp.ne.s32.totalorder %s505_s2, %s421_s10  ;;  %p425_p8 = scmp.lt.u32.totalorder %s421_s10, %s505_s2 }
 0x2b9   :  { %p427_p9 = pnand %p425_p8, %p422_p7 }
 0x2bb   :  { %430 = shalt.err (!%p427_p9)
}
 0x2bc   :  { %296 = dma.vmem_to_hbm [thread:$0]  %s294_s6, 128, %s505_s2, [#allocation4]  }
 0x2bd   :  { %435 = dma.done.wait [#allocation4], 128  }
 0x2be   :  { %436 = vsyncadd [#allocation4], 4294967168 }
 0x2bf   :  { %300 = vsyncpa [#allocation3], 1 }
 0x2c0   :  { %301 = vsyncpa [#allocation6], 1 }
 0x2c1   :  { %302 = vsyncpa [#allocation4], 1 }

</bundles_post_ra>
